<compile_context>
chip_gen: v5e
topology: v5e:2x2
jax: 0.10.0
libtpu: 0.0.40
codegen_flags: <defaults>
</compile_context>

<pallas_src>
from itertools import permutations

import numpy as np
import jax
import jax.numpy as jnp
from jax.experimental import pallas as pl
from jax.experimental.pallas import tpu as pltpu

# ---------------------------------------------------------------------------
# Hyper-parameters (mirror RnCritic.__init__ arguments)
# ---------------------------------------------------------------------------
NB_OBJECTS = 3
DIM_BODY = 8
DIM_OBJECT = 8
DIM_ACT = 4
DIM_G = 6                                              # goal / achieved-goal dim
EDGES = list(permutations(range(NB_OBJECTS), 2))       # 6 directed edges
N_PERM = NB_OBJECTS * (NB_OBJECTS - 1)                 # 6
PREDICATE_IDS = [[i % DIM_G, (i + 3) % DIM_G] for i in range(N_PERM)]
N_PRED = len(PREDICATE_IDS[0])                         # 2 predicates per edge

DIM_MP_INPUT = DIM_BODY + DIM_ACT + N_PRED + 3 + 3     # 20
DIM_MP_HIDDEN = 256
DIM_MP_OUTPUT = 32
DIM_RHO_INPUT = DIM_MP_OUTPUT
DIM_RHO_HIDDEN = 256
DIM_RHO_OUTPUT = 1
DIM_ATTN_K = 1                                         # SelfAttention(dim_mp_output, 1)
DIM_OBS = DIM_BODY + NB_OBJECTS * DIM_OBJECT           # 32
DIM_QKV = DIM_MP_OUTPUT + 2 * DIM_ATTN_K               # 34, fused [v | q | k]

BATCH = 2
MAX_BATCH_TILE = 128                                   # batch rows per grid step


# ---------------------------------------------------------------------------
# Deterministic parameter init (PyTorch nn.Linear default: U(-1/sqrt(fan_in), .))
# ---------------------------------------------------------------------------
def _linear_params(key, fan_in, fan_out):
    kw, kb = jax.random.split(key)
    bound = 1.0 / np.sqrt(fan_in)
    w = jax.random.uniform(kw, (fan_in, fan_out), jnp.float32, -bound, bound)
    b = jax.random.uniform(kb, (1, fan_out), jnp.float32, -bound, bound)
    return w, b


def init_params(key):
    keys = jax.random.split(key, 11)
    p = {}
    p["mp1_w1"], p["mp1_b1"] = _linear_params(keys[0], DIM_MP_INPUT, DIM_MP_HIDDEN)
    p["mp1_w2"], p["mp1_b2"] = _linear_params(keys[1], DIM_MP_HIDDEN, DIM_MP_OUTPUT)
    p["mp2_w1"], p["mp2_b1"] = _linear_params(keys[2], DIM_MP_OUTPUT, DIM_MP_HIDDEN)
    p["mp2_w2"], p["mp2_b2"] = _linear_params(keys[3], DIM_MP_HIDDEN, DIM_MP_OUTPUT)
    p["att_wq"], p["att_bq"] = _linear_params(keys[4], DIM_MP_OUTPUT, DIM_ATTN_K)
    p["att_wk"], p["att_bk"] = _linear_params(keys[5], DIM_MP_OUTPUT, DIM_ATTN_K)
    p["att_wv"], p["att_bv"] = _linear_params(keys[6], DIM_MP_OUTPUT, DIM_MP_OUTPUT)
    p["rho1_w1"], p["rho1_b1"] = _linear_params(keys[7], DIM_RHO_INPUT, DIM_RHO_HIDDEN)
    p["rho1_w2"], p["rho1_b2"] = _linear_params(keys[8], DIM_RHO_HIDDEN, DIM_RHO_OUTPUT)
    p["rho2_w1"], p["rho2_b1"] = _linear_params(keys[9], DIM_RHO_INPUT, DIM_RHO_HIDDEN)
    p["rho2_w2"], p["rho2_b2"] = _linear_params(keys[10], DIM_RHO_HIDDEN, DIM_RHO_OUTPUT)
    return p


# ---------------------------------------------------------------------------
# Weight packing (done ONCE, outside the forward): collapses all parameters into
# 5 buffers (3 bf16 weight stacks + 1 bf16 output head + 1 f32 bias buffer).
# Row blocks are 16-aligned so the in-kernel static ref slices stay aligned to
# the bf16 (16, 128) tile.
# ---------------------------------------------------------------------------
def pack_params(p):
    f = lambda a: np.asarray(a, np.float32)

    # wA: "feature -> 256" weights
    #   [  0: 20) mp1_w1   [ 32: 64) mp2_w1   [ 64: 96) rho1_w1   [ 96:128) rho2_w1
    wA = np.zeros((128, DIM_MP_HIDDEN), np.float32)
    wA[0:DIM_MP_INPUT, :] = f(p["mp1_w1"])
    wA[32:64, :] = f(p["mp2_w1"])
    wA[64:96, :] = f(p["rho1_w1"])
    wA[96:128, :] = f(p["rho2_w1"])

    # wB: "256 -> 32" weights: [0:256) mp1_w2, [256:512) mp2_w2
    wB = np.zeros((512, DIM_MP_OUTPUT), np.float32)
    wB[0:256, :] = f(p["mp1_w2"])
    wB[256:512, :] = f(p["mp2_w2"])

    # fused [v | q | k] attention projection (32, 34)
    wqkv = np.concatenate([f(p["att_wv"]), f(p["att_wq"]), f(p["att_wk"])], axis=1)

    # block-diagonal twin rho output head (512, 2)
    wC = np.zeros((2 * DIM_RHO_HIDDEN, 2), np.float32)
    wC[:DIM_RHO_HIDDEN, 0] = f(p["rho1_w2"])[:, 0]
    wC[DIM_RHO_HIDDEN:, 1] = f(p["rho2_w2"])[:, 0]

    # all biases in one (8, 256) f32 buffer, one bias vector per row (zero padded)
    biases = np.zeros((8, DIM_MP_HIDDEN), np.float32)
    biases[0, :] = f(p["mp1_b1"])[0]
    biases[1, :] = f(p["mp2_b1"])[0]
    biases[2, :] = f(p["rho1_b1"])[0]
    biases[3, :] = f(p["rho2_b1"])[0]
    biases[4, 0:DIM_MP_OUTPUT] = f(p["mp1_b2"])[0]
    biases[5, 0:DIM_MP_OUTPUT] = f(p["mp2_b2"])[0]
    biases[6, 0:DIM_QKV] = np.concatenate(
        [f(p["att_bv"])[0], f(p["att_bq"])[0], f(p["att_bk"])[0]])
    biases[7, 0:2] = np.concatenate([f(p["rho1_b2"])[0], f(p["rho2_b2"])[0]])

    return {
        "wA": jnp.asarray(wA, jnp.bfloat16),
        "wB": jnp.asarray(wB, jnp.bfloat16),
        "wqkv": jnp.asarray(wqkv, jnp.bfloat16),
        "wC": jnp.asarray(wC, jnp.bfloat16),
        "biases": jnp.asarray(biases, jnp.float32),
    }


# ---------------------------------------------------------------------------
# Per-edge input assembly (wrapper-side, tiny): row r = b * N_PERM + e (batch-major)
# ---------------------------------------------------------------------------
def build_edge_inputs(obs, act, ag, g):
    batch = obs.shape[0]
    obs_body = obs[:, :DIM_BODY]
    obs_obj_pos = [obs[:, DIM_BODY + DIM_OBJECT * i: DIM_BODY + DIM_OBJECT * i + 3]
                   for i in range(NB_OBJECTS)]
    delta_g = g - ag
    per_edge = [jnp.concatenate(
        [obs_body, act, delta_g[:, jnp.array(PREDICATE_IDS[i])],
         obs_obj_pos[EDGES[i][0]], obs_obj_pos[EDGES[i][1]]], axis=-1)
        for i in range(N_PERM)]
    x = jnp.stack(per_edge, axis=1)                     # (batch, N_PERM, 20)
    return x.reshape(batch * N_PERM, DIM_MP_INPUT)


# ---------------------------------------------------------------------------
# Fused kernel: MP(2 blocks) -> edge self-attention (k=1) -> sum -> twin rho heads
# One batch tile per grid step; weights stay VMEM-resident across steps.
# ---------------------------------------------------------------------------
def _rn_critic_kernel(x_ref, wA_ref, wB_ref, wqkv_ref, wC_ref, b_ref, out_ref):
    f32 = jnp.float32
    rows = x_ref.shape[0]            # tb * N_PERM  (static tile size)
    tb = out_ref.shape[0]            # batch tile
    Np = N_PERM

    def dot(a, b):
        return jnp.dot(a, b, preferred_element_type=f32)

    def w(ref, r0, r1):              # bf16 weight slice -> f32 (storage-only compression)
        return ref[r0:r1, :].astype(f32)

    # ---- packed biases (one vector per sublane of the f32 bias buffer) ----
    b1 = b_ref[0:1, :]
    b3 = b_ref[1:2, :]
    rb1a = b_ref[2:3, :]
    rb1b = b_ref[3:4, :]
    b2 = b_ref[4:5, 0:DIM_MP_OUTPUT]
    b4 = b_ref[5:6, 0:DIM_MP_OUTPUT]
    bqkv = b_ref[6:7, 0:DIM_QKV]
    rb2 = b_ref[7:8, 0:2]

    # ---- GnnMessagePassing 1 & 2 (2-layer ReLU MLPs, batched over (batch, edge) rows)
    x = x_ref[...]
    h = jnp.maximum(dot(x, w(wA_ref, 0, DIM_MP_INPUT)) + b1, 0.0)     # (rows, 256)
    h = jnp.maximum(dot(h, w(wB_ref, 0, 256)) + b2, 0.0)              # (rows, 32)
    h = jnp.maximum(dot(h, w(wA_ref, 32, 64)) + b3, 0.0)              # (rows, 256)
    e = jnp.maximum(dot(h, w(wB_ref, 256, 512)) + b4, 0.0)            # (rows, 32)

    # ---- fused [v | q | k] projection ----
    qkv = dot(e, wqkv_ref[...].astype(f32)) + bqkv                    # (rows, 34)
    v = qkv[:, 0:DIM_MP_OUTPUT]                                       # (rows, 32)
    q = qkv[:, DIM_MP_OUTPUT:DIM_MP_OUTPUT + 1]                       # (rows, 1)
    k = qkv[:, DIM_MP_OUTPUT + 1:DIM_MP_OUTPUT + 2]                   # (rows, 1)

    # ---- 0/1 layout masks, generated in-kernel from iota (no HBM constants,
    #      no O(rows^2) intermediates).  Local row r = b * Np + e. ----
    def idx(shape, dim):
        return jax.lax.broadcasted_iota(jnp.int32, shape, dim).astype(f32)

    def edge_of(shape, dim):         # r mod Np (exact in f32 at these sizes)
        r = idx(shape, dim)
        return r - jnp.floor(r / Np) * Np

    def batch_of(shape, dim):        # r // Np
        return jnp.floor(idx(shape, dim) / Np)

    emask = (edge_of((rows, Np), 0) == idx((rows, Np), 1)).astype(f32)      # (rows, Np)
    emaskT = (edge_of((Np, rows), 1) == idx((Np, rows), 0)).astype(f32)     # (Np, rows)
    sel_br = (batch_of((tb, rows), 1) == idx((tb, rows), 0)).astype(f32)    # (tb, rows)
    sel_rb = (batch_of((rows, tb), 0) == idx((rows, tb), 1)).astype(f32)    # (rows, tb)

    # ---- k=1 self-attention over edges (per batch element, softmax along lanes) ----
    k_mat = dot(sel_br, k * emask)                                          # (tb, Np)
    k_big = dot(sel_rb, k_mat)                                              # (rows, Np)
    scores = (q * k_big) * (1.0 / np.sqrt(float(DIM_ATTN_K)))
    scores = scores - jnp.max(scores, axis=-1, keepdims=True)
    ew = jnp.exp(scores)
    attn = ew * pl.reciprocal(jnp.sum(ew, axis=-1, keepdims=True), approx=True)

    # per-batch column sums of attention (sum over query rows), then one MXU
    # contraction for the attention-weighted value sum.
    colw = dot(sel_br, attn)                                                # (tb, Np)
    w_rv = dot(colw, emaskT) * sel_br                                       # (tb, rows)
    pooled = dot(w_rv, v)                                                   # (tb, 32)

    # ---- twin rho heads: two hidden dots + block-diagonal output head,
    #      single lane-dense (tb, 2) fused store.
    h1 = jnp.maximum(dot(pooled, w(wA_ref, 64, 96)) + rb1a, 0.0)            # (tb, 256)
    h2 = jnp.maximum(dot(pooled, w(wA_ref, 96, 128)) + rb1b, 0.0)           # (tb, 256)
    hcat = jnp.concatenate([h1, h2], axis=1)                                # (tb, 512)
    out_ref[...] = dot(hcat, wC_ref[...].astype(f32)) + rb2                 # (tb, 2)


def rn_critic_forward(packed, obs, act, ag, g):
    batch = obs.shape[0]
    x = build_edge_inputs(obs, act, ag, g)               # (batch*N_PERM, 20) f32

    if batch <= MAX_BATCH_TILE:
        tb = batch
    else:
        assert batch % MAX_BATCH_TILE == 0, "large batches must be a multiple of the tile"
        tb = MAX_BATCH_TILE
    rows_t = tb * N_PERM
    grid = (pl.cdiv(batch, tb),)

    const = lambda i: (0, 0)                              # weights stay VMEM-resident
    out = pl.pallas_call(
        _rn_critic_kernel,
        out_shape=jax.ShapeDtypeStruct((batch, 2), jnp.float32),
        grid=grid,
        in_specs=[
            pl.BlockSpec((rows_t, DIM_MP_INPUT), lambda i: (i, 0)),
            pl.BlockSpec(packed["wA"].shape, const),
            pl.BlockSpec(packed["wB"].shape, const),
            pl.BlockSpec(packed["wqkv"].shape, const),
            pl.BlockSpec(packed["wC"].shape, const),
            pl.BlockSpec(packed["biases"].shape, const),
        ],
        out_specs=pl.BlockSpec((tb, 2), lambda i: (i, 0)),
        compiler_params=pltpu.CompilerParams(dimension_semantics=("parallel",)),
    )(x, packed["wA"], packed["wB"], packed["wqkv"], packed["wC"], packed["biases"])
    return out[:, 0:1], out[:, 1:2]


# ---------------------------------------------------------------------------
# Pure-JAX reference (original, un-packed formulation) for the correctness check
# ---------------------------------------------------------------------------
def _build_inp_mp(obs, act, ag, g):
    obs_body = obs[:, :DIM_BODY]
    obs_objects = [obs[:, DIM_BODY + DIM_OBJECT * i: DIM_BODY + DIM_OBJECT * (i + 1)]
                   for i in range(NB_OBJECTS)]
    delta_g = g - ag
    inp_mp = jnp.stack([
        jnp.concatenate([obs_body,
                         act,
                         delta_g[:, jnp.array(PREDICATE_IDS[i])],
                         obs_objects[EDGES[i][0]][:, :3],
                         obs_objects[EDGES[i][1]][:, :3]], axis=-1)
        for i in range(N_PERM)], axis=0)                  # (n_perm, batch, dim_mp_input)
    return inp_mp


def rn_critic_reference(params, obs, act, ag, g):
    batch = obs.shape[0]
    p = params
    inp_mp = _build_inp_mp(obs, act, ag, g)
    flat = inp_mp.reshape(N_PERM * batch, DIM_MP_INPUT)
    hp = jax.lax.Precision.HIGHEST
    h = jax.nn.relu(jnp.dot(flat, p["mp1_w1"], precision=hp) + p["mp1_b1"])
    h = jax.nn.relu(jnp.dot(h, p["mp1_w2"], precision=hp) + p["mp1_b2"])
    h = jax.nn.relu(jnp.dot(h, p["mp2_w1"], precision=hp) + p["mp2_b1"])
    h = jax.nn.relu(jnp.dot(h, p["mp2_w2"], precision=hp) + p["mp2_b2"])
    e = jnp.transpose(h.reshape(N_PERM, batch, DIM_MP_OUTPUT), (1, 0, 2))
    q = jnp.einsum("bnd,dk->bnk", e, p["att_wq"], precision=hp) + p["att_bq"]
    k = jnp.einsum("bnd,dk->bnk", e, p["att_wk"], precision=hp) + p["att_bk"]
    v = jnp.einsum("bnd,de->bne", e, p["att_wv"], precision=hp) + p["att_bv"]
    scores = jnp.einsum("bnk,bmk->bnm", q, k, precision=hp) / jnp.sqrt(jnp.float32(DIM_ATTN_K))
    attn = jax.nn.softmax(scores, axis=-1)
    out = jnp.einsum("bnm,bmd->bnd", attn, v, precision=hp)
    pooled = out.sum(axis=-2)
    h1 = jax.nn.relu(jnp.dot(pooled, p["rho1_w1"], precision=hp) + p["rho1_b1"])
    q1 = jnp.dot(h1, p["rho1_w2"], precision=hp) + p["rho1_b2"]
    h2 = jax.nn.relu(jnp.dot(pooled, p["rho2_w1"], precision=hp) + p["rho2_b1"])
    q2 = jnp.dot(h2, p["rho2_w2"], precision=hp) + p["rho2_b2"]
    return q1, q2


if __name__ == "__main__":
    key = jax.random.PRNGKey(0)
    k_param, k_obs, k_act, k_ag, k_g = jax.random.split(key, 5)
    params = init_params(k_param)
    packed = pack_params(params)

    obs = jax.random.normal(k_obs, (BATCH, DIM_OBS), jnp.float32)
    act = jax.random.normal(k_act, (BATCH, DIM_ACT), jnp.float32)
    ag = jax.random.normal(k_ag, (BATCH, DIM_G), jnp.float32)
    g = jax.random.normal(k_g, (BATCH, DIM_G), jnp.float32)

    fwd = jax.jit(rn_critic_forward)
    q1, q2 = fwd(packed, obs, act, ag, g)
    jax.block_until_ready((q1, q2))

    q1_ref, q2_ref = rn_critic_reference(params, obs, act, ag, g)

    assert q1.shape == (BATCH, DIM_RHO_OUTPUT) and q2.shape == (BATCH, DIM_RHO_OUTPUT)
    assert np.allclose(np.asarray(q1), np.asarray(q1_ref), atol=1e-2, rtol=1e-2), (q1, q1_ref)
    assert np.allclose(np.asarray(q2), np.asarray(q2_ref), atol=1e-2, rtol=1e-2), (q2, q2_ref)
    print("KERNEL_OK")
</pallas_src>

<mosaic_0001>
module attributes {stable_mosaic.version = 11 : i64} {
  func.func @_rn_critic_kernel(%arg0: i32, %arg1: memref<12x20xf32, #tpu.memory_space<vmem>>, %arg2: memref<128x256xbf16, #tpu.memory_space<vmem>>, %arg3: memref<512x32xbf16, #tpu.memory_space<vmem>>, %arg4: memref<32x34xbf16, #tpu.memory_space<vmem>>, %arg5: memref<512x2xbf16, #tpu.memory_space<vmem>>, %arg6: memref<8x256xf32, #tpu.memory_space<vmem>>, %arg7: memref<2x2xf32, #tpu.memory_space<vmem>>) attributes {dimension_semantics = [#tpu.dimension_semantics<parallel>], iteration_bounds = array<i64: 1>, scalar_prefetch = 0 : i64, scratch_operands = 0 : i64, tpu.core_type = #tpu.core_type<tc>, window_params = [{transform_indices = @transform_0, window_bounds = array<i64: 12, 20>}, {pipeline_mode = #tpu.pipeline_mode<synchronous>, transform_indices = @transform_1, window_bounds = array<i64: 128, 256>}, {pipeline_mode = #tpu.pipeline_mode<synchronous>, transform_indices = @transform_2, window_bounds = array<i64: 512, 32>}, {pipeline_mode = #tpu.pipeline_mode<synchronous>, transform_indices = @transform_3, window_bounds = array<i64: 32, 34>}, {pipeline_mode = #tpu.pipeline_mode<synchronous>, transform_indices = @transform_4, window_bounds = array<i64: 512, 2>}, {pipeline_mode = #tpu.pipeline_mode<synchronous>, transform_indices = @transform_5, window_bounds = array<i64: 8, 256>}, {transform_indices = @transform_6, window_bounds = array<i64: 2, 2>}]} {
    %c0 = arith.constant 0 : index
    %c0_0 = arith.constant 0 : index
    %0 = vector.load %arg6[%c0, %c0_0] : memref<8x256xf32, #tpu.memory_space<vmem>>, vector<1x256xf32>
    %c1 = arith.constant 1 : index
    %c0_1 = arith.constant 0 : index
    %1 = vector.load %arg6[%c1, %c0_1] : memref<8x256xf32, #tpu.memory_space<vmem>>, vector<1x256xf32>
    %c2 = arith.constant 2 : index
    %c0_2 = arith.constant 0 : index
    %2 = vector.load %arg6[%c2, %c0_2] : memref<8x256xf32, #tpu.memory_space<vmem>>, vector<1x256xf32>
    %c3 = arith.constant 3 : index
    %c0_3 = arith.constant 0 : index
    %3 = vector.load %arg6[%c3, %c0_3] : memref<8x256xf32, #tpu.memory_space<vmem>>, vector<1x256xf32>
    %c4 = arith.constant 4 : index
    %c0_4 = arith.constant 0 : index
    %4 = vector.load %arg6[%c4, %c0_4] : memref<8x256xf32, #tpu.memory_space<vmem>>, vector<1x32xf32>
    %c5 = arith.constant 5 : index
    %c0_5 = arith.constant 0 : index
    %5 = vector.load %arg6[%c5, %c0_5] : memref<8x256xf32, #tpu.memory_space<vmem>>, vector<1x32xf32>
    %c6 = arith.constant 6 : index
    %c0_6 = arith.constant 0 : index
    %6 = vector.load %arg6[%c6, %c0_6] : memref<8x256xf32, #tpu.memory_space<vmem>>, vector<1x34xf32>
    %c7 = arith.constant 7 : index
    %c0_7 = arith.constant 0 : index
    %7 = vector.load %arg6[%c7, %c0_7] : memref<8x256xf32, #tpu.memory_space<vmem>>, vector<1x2xf32>
    %c0_8 = arith.constant 0 : index
    %c0_9 = arith.constant 0 : index
    %8 = vector.load %arg1[%c0_8, %c0_9] : memref<12x20xf32, #tpu.memory_space<vmem>>, vector<12x20xf32>
    %c0_10 = arith.constant 0 : index
    %c0_11 = arith.constant 0 : index
    %9 = vector.load %arg2[%c0_10, %c0_11] : memref<128x256xbf16, #tpu.memory_space<vmem>>, vector<20x256xbf16>
    %10 = arith.extf %9 : vector<20x256xbf16> to vector<20x256xf32>
    %cst = arith.constant dense<0.000000e+00> : vector<12x256xf32>
    %11 = tpu.matmul %8, %10, %cst {dimension_numbers = #tpu.dot_dimension_numbers<[1], [0], [0], [1], [0, 0, 1, 1], [], []>} : vector<12x20xf32>, vector<20x256xf32>, vector<12x256xf32> -> vector<12x256xf32>
    %12 = vector.broadcast %0 : vector<1x256xf32> to vector<12x256xf32>
    %13 = arith.addf %11, %12 : vector<12x256xf32>
    %cst_12 = arith.constant 0.000000e+00 : f32
    %14 = vector.broadcast %cst_12 : f32 to vector<12x256xf32>
    %15 = arith.maximumf %13, %14 : vector<12x256xf32>
    %c0_13 = arith.constant 0 : index
    %c0_14 = arith.constant 0 : index
    %16 = vector.load %arg3[%c0_13, %c0_14] : memref<512x32xbf16, #tpu.memory_space<vmem>>, vector<256x32xbf16>
    %17 = arith.extf %16 : vector<256x32xbf16> to vector<256x32xf32>
    %cst_15 = arith.constant dense<0.000000e+00> : vector<12x32xf32>
    %18 = tpu.matmul %15, %17, %cst_15 {dimension_numbers = #tpu.dot_dimension_numbers<[1], [0], [0], [1], [0, 0, 1, 1], [], []>} : vector<12x256xf32>, vector<256x32xf32>, vector<12x32xf32> -> vector<12x32xf32>
    %19 = vector.broadcast %4 : vector<1x32xf32> to vector<12x32xf32>
    %20 = arith.addf %18, %19 : vector<12x32xf32>
    %cst_16 = arith.constant 0.000000e+00 : f32
    %21 = vector.broadcast %cst_16 : f32 to vector<12x32xf32>
    %22 = arith.maximumf %20, %21 : vector<12x32xf32>
    %c32 = arith.constant 32 : index
    %c0_17 = arith.constant 0 : index
    %23 = vector.load %arg2[%c32, %c0_17] : memref<128x256xbf16, #tpu.memory_space<vmem>>, vector<32x256xbf16>
    %24 = arith.extf %23 : vector<32x256xbf16> to vector<32x256xf32>
    %cst_18 = arith.constant dense<0.000000e+00> : vector<12x256xf32>
    %25 = tpu.matmul %22, %24, %cst_18 {dimension_numbers = #tpu.dot_dimension_numbers<[1], [0], [0], [1], [0, 0, 1, 1], [], []>} : vector<12x32xf32>, vector<32x256xf32>, vector<12x256xf32> -> vector<12x256xf32>
    %26 = vector.broadcast %1 : vector<1x256xf32> to vector<12x256xf32>
    %27 = arith.addf %25, %26 : vector<12x256xf32>
    %cst_19 = arith.constant 0.000000e+00 : f32
    %28 = vector.broadcast %cst_19 : f32 to vector<12x256xf32>
    %29 = arith.maximumf %27, %28 : vector<12x256xf32>
    %c256 = arith.constant 256 : index
    %c0_20 = arith.constant 0 : index
    %30 = vector.load %arg3[%c256, %c0_20] : memref<512x32xbf16, #tpu.memory_space<vmem>>, vector<256x32xbf16>
    %31 = arith.extf %30 : vector<256x32xbf16> to vector<256x32xf32>
    %cst_21 = arith.constant dense<0.000000e+00> : vector<12x32xf32>
    %32 = tpu.matmul %29, %31, %cst_21 {dimension_numbers = #tpu.dot_dimension_numbers<[1], [0], [0], [1], [0, 0, 1, 1], [], []>} : vector<12x256xf32>, vector<256x32xf32>, vector<12x32xf32> -> vector<12x32xf32>
    %33 = vector.broadcast %5 : vector<1x32xf32> to vector<12x32xf32>
    %34 = arith.addf %32, %33 : vector<12x32xf32>
    %cst_22 = arith.constant 0.000000e+00 : f32
    %35 = vector.broadcast %cst_22 : f32 to vector<12x32xf32>
    %36 = arith.maximumf %34, %35 : vector<12x32xf32>
    %c0_23 = arith.constant 0 : index
    %c0_24 = arith.constant 0 : index
    %37 = vector.load %arg4[%c0_23, %c0_24] : memref<32x34xbf16, #tpu.memory_space<vmem>>, vector<32x34xbf16>
    %38 = arith.extf %37 : vector<32x34xbf16> to vector<32x34xf32>
    %cst_25 = arith.constant dense<0.000000e+00> : vector<12x34xf32>
    %39 = tpu.matmul %36, %38, %cst_25 {dimension_numbers = #tpu.dot_dimension_numbers<[1], [0], [0], [1], [0, 0, 1, 1], [], []>} : vector<12x32xf32>, vector<32x34xf32>, vector<12x34xf32> -> vector<12x34xf32>
    %40 = vector.broadcast %6 : vector<1x34xf32> to vector<12x34xf32>
    %41 = arith.addf %39, %40 : vector<12x34xf32>
    %42 = vector.extract_strided_slice %41 {offsets = [0, 0], sizes = [12, 32], strides = [1, 1]} : vector<12x34xf32> to vector<12x32xf32>
    %43 = vector.extract_strided_slice %41 {offsets = [0, 32], sizes = [12, 1], strides = [1, 1]} : vector<12x34xf32> to vector<12x1xf32>
    %44 = vector.extract_strided_slice %41 {offsets = [0, 33], sizes = [12, 1], strides = [1, 1]} : vector<12x34xf32> to vector<12x1xf32>
    %45 = tpu.iota {dimensions = array<i32: 0>} : vector<12x6xi32>
    %46 = arith.sitofp %45 : vector<12x6xi32> to vector<12x6xf32>
    %cst_26 = arith.constant 6.000000e+00 : f32
    %47 = vector.broadcast %cst_26 : f32 to vector<12x6xf32>
    %48 = arith.divf %46, %47 : vector<12x6xf32>
    %49 = math.floor %48 : vector<12x6xf32>
    %cst_27 = arith.constant 6.000000e+00 : f32
    %50 = vector.broadcast %cst_27 : f32 to vector<12x6xf32>
    %51 = arith.mulf %49, %50 : vector<12x6xf32>
    %52 = arith.subf %46, %51 : vector<12x6xf32>
    %53 = tpu.iota {dimensions = array<i32: 1>} : vector<12x6xi32>
    %54 = arith.sitofp %53 : vector<12x6xi32> to vector<12x6xf32>
    %55 = arith.cmpf oeq, %52, %54 : vector<12x6xf32>
    %56 = arith.extui %55 : vector<12x6xi1> to vector<12x6xi32>
    %57 = arith.sitofp %56 : vector<12x6xi32> to vector<12x6xf32>
    %58 = tpu.iota {dimensions = array<i32: 1>} : vector<6x12xi32>
    %59 = arith.sitofp %58 : vector<6x12xi32> to vector<6x12xf32>
    %cst_28 = arith.constant 6.000000e+00 : f32
    %60 = vector.broadcast %cst_28 : f32 to vector<6x12xf32>
    %61 = arith.divf %59, %60 : vector<6x12xf32>
    %62 = math.floor %61 : vector<6x12xf32>
    %cst_29 = arith.constant 6.000000e+00 : f32
    %63 = vector.broadcast %cst_29 : f32 to vector<6x12xf32>
    %64 = arith.mulf %62, %63 : vector<6x12xf32>
    %65 = arith.subf %59, %64 : vector<6x12xf32>
    %66 = tpu.iota {dimensions = array<i32: 0>} : vector<6x12xi32>
    %67 = arith.sitofp %66 : vector<6x12xi32> to vector<6x12xf32>
    %68 = arith.cmpf oeq, %65, %67 : vector<6x12xf32>
    %69 = arith.extui %68 : vector<6x12xi1> to vector<6x12xi32>
    %70 = arith.sitofp %69 : vector<6x12xi32> to vector<6x12xf32>
    %71 = tpu.iota {dimensions = array<i32: 1>} : vector<2x12xi32>
    %72 = arith.sitofp %71 : vector<2x12xi32> to vector<2x12xf32>
    %cst_30 = arith.constant 6.000000e+00 : f32
    %73 = vector.broadcast %cst_30 : f32 to vector<2x12xf32>
    %74 = arith.divf %72, %73 : vector<2x12xf32>
    %75 = math.floor %74 : vector<2x12xf32>
    %76 = tpu.iota {dimensions = array<i32: 0>} : vector<2x12xi32>
    %77 = arith.sitofp %76 : vector<2x12xi32> to vector<2x12xf32>
    %78 = arith.cmpf oeq, %75, %77 : vector<2x12xf32>
    %79 = arith.extui %78 : vector<2x12xi1> to vector<2x12xi32>
    %80 = arith.sitofp %79 : vector<2x12xi32> to vector<2x12xf32>
    %81 = tpu.iota {dimensions = array<i32: 0>} : vector<12x2xi32>
    %82 = arith.sitofp %81 : vector<12x2xi32> to vector<12x2xf32>
    %cst_31 = arith.constant 6.000000e+00 : f32
    %83 = vector.broadcast %cst_31 : f32 to vector<12x2xf32>
    %84 = arith.divf %82, %83 : vector<12x2xf32>
    %85 = math.floor %84 : vector<12x2xf32>
    %86 = tpu.iota {dimensions = array<i32: 1>} : vector<12x2xi32>
    %87 = arith.sitofp %86 : vector<12x2xi32> to vector<12x2xf32>
    %88 = arith.cmpf oeq, %85, %87 : vector<12x2xf32>
    %89 = arith.extui %88 : vector<12x2xi1> to vector<12x2xi32>
    %90 = arith.sitofp %89 : vector<12x2xi32> to vector<12x2xf32>
    %91 = vector.broadcast %44 : vector<12x1xf32> to vector<12x6xf32>
    %92 = arith.mulf %91, %57 : vector<12x6xf32>
    %cst_32 = arith.constant dense<0.000000e+00> : vector<2x6xf32>
    %93 = tpu.matmul %80, %92, %cst_32 {dimension_numbers = #tpu.dot_dimension_numbers<[1], [0], [0], [1], [0, 0, 1, 1], [], []>} : vector<2x12xf32>, vector<12x6xf32>, vector<2x6xf32> -> vector<2x6xf32>
    %cst_33 = arith.constant dense<0.000000e+00> : vector<12x6xf32>
    %94 = tpu.matmul %90, %93, %cst_33 {dimension_numbers = #tpu.dot_dimension_numbers<[1], [0], [0], [1], [0, 0, 1, 1], [], []>} : vector<12x2xf32>, vector<2x6xf32>, vector<12x6xf32> -> vector<12x6xf32>
    %95 = vector.broadcast %43 : vector<12x1xf32> to vector<12x6xf32>
    %96 = arith.mulf %95, %94 : vector<12x6xf32>
    %cst_34 = arith.constant 1.000000e+00 : f32
    %97 = vector.broadcast %cst_34 : f32 to vector<12x6xf32>
    %98 = arith.mulf %96, %97 : vector<12x6xf32>
    %cst_35 = arith.constant dense<0xFF800000> : vector<12xf32>
    %99 = vector.multi_reduction <maximumf>, %98, %cst_35 [1] : vector<12x6xf32> to vector<12xf32>
    %100 = vector.shape_cast %99 : vector<12xf32> to vector<12x1xf32>
    %101 = vector.broadcast %100 : vector<12x1xf32> to vector<12x6xf32>
    %102 = arith.subf %98, %101 : vector<12x6xf32>
    %103 = math.exp %102 : vector<12x6xf32>
    %cst_36 = arith.constant dense<0.000000e+00> : vector<12xf32>
    %104 = vector.multi_reduction <add>, %103, %cst_36 [1] : vector<12x6xf32> to vector<12xf32>
    %105 = vector.shape_cast %104 : vector<12xf32> to vector<12x1xf32>
    %106 = tpu.reciprocal %105 {approx = true} : vector<12x1xf32> -> vector<12x1xf32>
    %107 = vector.broadcast %106 : vector<12x1xf32> to vector<12x6xf32>
    %108 = arith.mulf %103, %107 : vector<12x6xf32>
    %cst_37 = arith.constant dense<0.000000e+00> : vector<2x6xf32>
    %109 = tpu.matmul %80, %108, %cst_37 {dimension_numbers = #tpu.dot_dimension_numbers<[1], [0], [0], [1], [0, 0, 1, 1], [], []>} : vector<2x12xf32>, vector<12x6xf32>, vector<2x6xf32> -> vector<2x6xf32>
    %cst_38 = arith.constant dense<0.000000e+00> : vector<2x12xf32>
    %110 = tpu.matmul %109, %70, %cst_38 {dimension_numbers = #tpu.dot_dimension_numbers<[1], [0], [0], [1], [0, 0, 1, 1], [], []>} : vector<2x6xf32>, vector<6x12xf32>, vector<2x12xf32> -> vector<2x12xf32>
    %111 = arith.mulf %110, %80 : vector<2x12xf32>
    %cst_39 = arith.constant dense<0.000000e+00> : vector<2x32xf32>
    %112 = tpu.matmul %111, %42, %cst_39 {dimension_numbers = #tpu.dot_dimension_numbers<[1], [0], [0], [1], [0, 0, 1, 1], [], []>} : vector<2x12xf32>, vector<12x32xf32>, vector<2x32xf32> -> vector<2x32xf32>
    %c64 = arith.constant 64 : index
    %c0_40 = arith.constant 0 : index
    %113 = vector.load %arg2[%c64, %c0_40] : memref<128x256xbf16, #tpu.memory_space<vmem>>, vector<32x256xbf16>
    %114 = arith.extf %113 : vector<32x256xbf16> to vector<32x256xf32>
    %cst_41 = arith.constant dense<0.000000e+00> : vector<2x256xf32>
    %115 = tpu.matmul %112, %114, %cst_41 {dimension_numbers = #tpu.dot_dimension_numbers<[1], [0], [0], [1], [0, 0, 1, 1], [], []>} : vector<2x32xf32>, vector<32x256xf32>, vector<2x256xf32> -> vector<2x256xf32>
    %116 = vector.broadcast %2 : vector<1x256xf32> to vector<2x256xf32>
    %117 = arith.addf %115, %116 : vector<2x256xf32>
    %cst_42 = arith.constant 0.000000e+00 : f32
    %118 = vector.broadcast %cst_42 : f32 to vector<2x256xf32>
    %119 = arith.maximumf %117, %118 : vector<2x256xf32>
    %c96 = arith.constant 96 : index
    %c0_43 = arith.constant 0 : index
    %120 = vector.load %arg2[%c96, %c0_43] : memref<128x256xbf16, #tpu.memory_space<vmem>>, vector<32x256xbf16>
    %121 = arith.extf %120 : vector<32x256xbf16> to vector<32x256xf32>
    %cst_44 = arith.constant dense<0.000000e+00> : vector<2x256xf32>
    %122 = tpu.matmul %112, %121, %cst_44 {dimension_numbers = #tpu.dot_dimension_numbers<[1], [0], [0], [1], [0, 0, 1, 1], [], []>} : vector<2x32xf32>, vector<32x256xf32>, vector<2x256xf32> -> vector<2x256xf32>
    %123 = vector.broadcast %3 : vector<1x256xf32> to vector<2x256xf32>
    %124 = arith.addf %122, %123 : vector<2x256xf32>
    %cst_45 = arith.constant 0.000000e+00 : f32
    %125 = vector.broadcast %cst_45 : f32 to vector<2x256xf32>
    %126 = arith.maximumf %124, %125 : vector<2x256xf32>
    %127 = tpu.concatenate %119, %126 in 1 : vector<2x256xf32>, vector<2x256xf32> -> vector<2x512xf32>
    %c0_46 = arith.constant 0 : index
    %c0_47 = arith.constant 0 : index
    %128 = vector.load %arg5[%c0_46, %c0_47] : memref<512x2xbf16, #tpu.memory_space<vmem>>, vector<512x2xbf16>
    %129 = arith.extf %128 : vector<512x2xbf16> to vector<512x2xf32>
    %cst_48 = arith.constant dense<0.000000e+00> : vector<2x2xf32>
    %130 = tpu.matmul %127, %129, %cst_48 {dimension_numbers = #tpu.dot_dimension_numbers<[1], [0], [0], [1], [0, 0, 1, 1], [], []>} : vector<2x512xf32>, vector<512x2xf32>, vector<2x2xf32> -> vector<2x2xf32>
    %131 = vector.broadcast %7 : vector<1x2xf32> to vector<2x2xf32>
    %132 = arith.addf %130, %131 : vector<2x2xf32>
    %c0_49 = arith.constant 0 : index
    %c0_50 = arith.constant 0 : index
    %133 = vector.load %arg7[%c0_49, %c0_50] : memref<2x2xf32, #tpu.memory_space<vmem>>, vector<2x2xf32>
    tpu.vector_store %arg7[%c0_49, %c0_50], %132 {strides = array<i32>} : memref<2x2xf32, #tpu.memory_space<vmem>>, vector<2x2xf32>,
    return
  }
  func.func @transform_0(%arg0: i32) -> (i32, i32) {
    %c0_i32 = arith.constant 0 : i32
    %c0_i32_0 = arith.constant 0 : i32
    return %arg0, %c0_i32 : i32, i32
  }
  func.func @transform_1(%arg0: i32) -> (i32, i32) {
    %c0_i32 = arith.constant 0 : i32
    %c0_i32_0 = arith.constant 0 : i32
    %c0_i32_1 = arith.constant 0 : i32
    return %c0_i32, %c0_i32_0 : i32, i32
  }
  func.func @transform_2(%arg0: i32) -> (i32, i32) {
    %c0_i32 = arith.constant 0 : i32
    %c0_i32_0 = arith.constant 0 : i32
    %c0_i32_1 = arith.constant 0 : i32
    return %c0_i32, %c0_i32_0 : i32, i32
  }
  func.func @transform_3(%arg0: i32) -> (i32, i32) {
    %c0_i32 = arith.constant 0 : i32
    %c0_i32_0 = arith.constant 0 : i32
    %c0_i32_1 = arith.constant 0 : i32
    return %c0_i32, %c0_i32_0 : i32, i32
  }
  func.func @transform_4(%arg0: i32) -> (i32, i32) {
    %c0_i32 = arith.constant 0 : i32
    %c0_i32_0 = arith.constant 0 : i32
    %c0_i32_1 = arith.constant 0 : i32
    return %c0_i32, %c0_i32_0 : i32, i32
  }
  func.func @transform_5(%arg0: i32) -> (i32, i32) {
    %c0_i32 = arith.constant 0 : i32
    %c0_i32_0 = arith.constant 0 : i32
    %c0_i32_1 = arith.constant 0 : i32
    return %c0_i32, %c0_i32_0 : i32, i32
  }
  func.func @transform_6(%arg0: i32) -> (i32, i32) {
    %c0_i32 = arith.constant 0 : i32
    %c0_i32_0 = arith.constant 0 : i32
    return %arg0, %c0_i32 : i32, i32
  }
}

</mosaic_0001>

<bundles_post_ra>
// kernel: sub.1
= control target key start
LH: loop header
LB: loop body
LE: loop exit
PB: predicated region body
PF: predicated region fallthrough
CT: control target
= control target key end

     0   :  { %s34_s0 = inlined_call_operand.vmem [shape: f32[2,6], index: 0, kind: input, shape index: {}]   ;;  %s35_s1 = inlined_call_operand.vmem [shape: f32[2,6], index: 1, kind: input, shape index: {}]   ;;  %s36_s2 = inlined_call_operand.vmem [shape: f32[2,6], index: 2, kind: output, shape index: {}]  }
   0x1   :  { %v3_v0 = vld [vmem:[%s34_s0] sm:$0x3f] }
   0x2   :  { %v4_v1 = vld [vmem:[%s35_s1] sm:$0x3f] }
   0x3   :  { %v7_v2 = vsub.f32 %v3_v0, %v4_v1 }
   0x5   :  { %9 = vst [vmem:[%s36_s2] sm:$0xff] %v7_v2 }

// kernel: rn_critic_forward.1
= control target key start
LH: loop header
LB: loop body
LE: loop exit
PB: predicated region body
PF: predicated region fallthrough
CT: control target
= control target key end

     0   :  { %vm57_vm0 = vcmask 1043456   ;;  %vm50_vm1 = vcmask 162816   ;;  %vm243_vm2 = vcmask 261120   ;;  %vm506_vm7 = vcmask 97280   ;;  %s1745_s1 = inlined_call_operand.vmem [shape: bf16[128,256], index: 1, kind: input, shape index: {}]   ;;  %s1746_s2 = inlined_call_operand.vmem [shape: bf16[512,32], index: 2, kind: input, shape index: {}]   ;;  %s1747_s0 = inlined_call_operand.vmem [shape: f32[12,20], index: 0, kind: input, shape index: {}]   ;;  %s1748_s5 = inlined_call_operand.vmem [shape: f32[8,256], index: 5, kind: input, shape index: {}]   ;;  %s1749_s3 = inlined_call_operand.vmem [shape: bf16[32,34], index: 3, kind: input, shape index: {}]   ;;  %s1750_s4 = inlined_call_operand.vmem [shape: bf16[512,2], index: 4, kind: input, shape index: {}]   ;;  %s1751_s6 = inlined_call_operand.vmem [shape: f32[2,2], index: 6, kind: output, shape index: {}]  }
   0x1   :  { %v38_v0 = vld [vmem:[%s1745_s1 + $0x10] sm:$0x33]  ;;  %v37_v1 = vld [vmem:[%s1745_s1 + $0x8] sm:$0xff]  ;;  %v36_v2 = vld [vmem:[%s1745_s1] sm:$0xff]  ;;  %vm540_vm9 = vcmask 1041408   ;;  %vm533_vm10 = vcmask 15360  }
   0x2   :  { %v43_v3 = vunpack.c.l.bf16 %v38_v0  ;;  %v41_v4 = vunpack.c.l.bf16 %v37_v1  ;;  %v44_v5 = vunpack.c.h.bf16 %v38_v0  ;;  %v1318_v6 = vld [vmem:[%s1746_s2 + $0x38] sm:$0xff]   ;;  %v42_v7 = vunpack.c.h.bf16 %v37_v1  ;;  %v1317_v11 = vld [vmem:[%s1746_s2 + $0x30] sm:$0xff]   ;;  %v34_v16 = vld [vmem:[%s1747_s0] sm:$0xff] }
   0x3   :  { %v1079_v8 = vunpack.c.h.bf16 %v1318_v6  ;;  %v1078_v9 = vunpack.c.l.bf16 %v1318_v6  ;;  %v1326_v10 = vld [vmem:[%s1746_s2 + $0x78] sm:$0xff]   ;;  %v39_v12 = vunpack.c.l.bf16 %v36_v2  ;;  %v40_v13 = vunpack.c.h.bf16 %v36_v2  ;;  %v1325_v15 = vld [vmem:[%s1746_s2 + $0x70] sm:$0xff]   ;;  %v1316_v19 = vld [vmem:[%s1746_s2 + $0x28] sm:$0xff]  }
   0x4   :  { %1015 = vmatpush.msk.msra.mxu0 %vm57_vm0, %v43_v3  ;;  %1018 = vmatpush.msk.msra.mxu1 %vm57_vm0, %v44_v5  ;;  %v1111_v14 = vunpack.c.h.bf16 %v1326_v10  ;;  %v1075_v17 = vunpack.c.h.bf16 %v1317_v11  ;;  %v1110_v18 = vunpack.c.l.bf16 %v1326_v10  ;;  %v1074_v20 = vunpack.c.l.bf16 %v1317_v11  ;;  %v1324_v22 = vld [vmem:[%s1746_s2 + $0x68] sm:$0xff]   ;;  %v1315_v25 = vld [vmem:[%s1746_s2 + $0x20] sm:$0xff]   ;;  %v1314_v32 = vld [vmem:[%s1746_s2 + $0x18] sm:$0xff]  }
   0x5   :  { %178 = vmatpush.msra.mxu2 %v1079_v8  ;;  %v1107_v21 = vunpack.c.h.bf16 %v1325_v15  ;;  %v1071_v23 = vunpack.c.h.bf16 %v1316_v19  ;;  %v1106_v24 = vunpack.c.l.bf16 %v1325_v15  ;;  %v1070_v26 = vunpack.c.l.bf16 %v1316_v19  ;;  %v1323_v28 = vld [vmem:[%s1746_s2 + $0x60] sm:$0xff]   ;;  %v35_v29 = vld [vmem:[%s1747_s0 + $0x8] sm:$0xf]  ;;  %v1322_v35 = vld [vmem:[%s1746_s2 + $0x58] sm:$0xff]  }
   0x6   :  { %78 = vmatpush.msra.mxu0 %v41_v4  ;;  %101 = vmatpush.msra.mxu1 %v42_v7  ;;  %v1103_v27 = vunpack.c.h.bf16 %v1324_v22  ;;  %v1067_v30 = vunpack.c.h.bf16 %v1315_v25  ;;  %v1102_v31 = vunpack.c.l.bf16 %v1324_v22  ;;  %v1066_v33 = vunpack.c.l.bf16 %v1315_v25  ;;  %v1313_v38 = vld [vmem:[%s1746_s2 + $0x10] sm:$0xff]   ;;  %v1312_v44 = vld [vmem:[%s1746_s2 + $0x8] sm:$0xff]   ;;  %v1049_v52 = vld [vmem:[%s1746_s2] sm:$0xff]  }
   0x7   :  { %179 = vmatpush.msra.mxu2 %v1078_v9  ;;  %201 = vmatpush.msra.mxu3 %v1111_v14  ;;  %v1099_v34 = vunpack.c.h.bf16 %v1323_v28  ;;  %v1063_v36 = vunpack.c.h.bf16 %v1314_v32  ;;  %v1098_v37 = vunpack.c.l.bf16 %v1323_v28  ;;  %v1062_v39 = vunpack.c.l.bf16 %v1314_v32  ;;  %v1321_v41 = vld [vmem:[%s1746_s2 + $0x50] sm:$0xff]   ;;  %v1320_v49 = vld [vmem:[%s1746_s2 + $0x48] sm:$0xff]   ;;  %v1319_v55 = vld [vmem:[%s1746_s2 + $0x40] sm:$0xff]  }
   0x8   :  { %79 = vmatpush.msra.mxu0 %v39_v12  ;;  %102 = vmatpush.msra.mxu1 %v40_v13  ;;  %v1095_v40 = vunpack.c.h.bf16 %v1322_v35  ;;  %v1059_v42 = vunpack.c.h.bf16 %v1313_v38  ;;  %v1094_v43 = vunpack.c.l.bf16 %v1322_v35  ;;  %v1058_v45 = vunpack.c.l.bf16 %v1313_v38  ;;  %v229_v59 = vld [vmem:[%s1745_s1 + $0x38] sm:$0xff]  ;;  %v23_v61 = vld [vmem:[%s1748_s5] ss:$8 sm:$0x3]  ;;  %v228_v13 = vld [vmem:[%s1745_s1 + $0x30] sm:$0xff] }
   0x9   :  { %1016 = vmatmul.msk.f32.vlgmr.msra.gmra.mxu0 %vm50_vm1, %v34_v16  ;;  %1019 = vmatmul.msk.f32.vlgmr.msra.gmra.mxu1 %vm50_vm1, %v34_v16  ;;  %v1091_v46 = vunpack.c.h.bf16 %v1321_v41  ;;  %v1055_v47 = vunpack.c.h.bf16 %v1312_v44  ;;  %v1090_v48 = vunpack.c.l.bf16 %v1321_v41  ;;  %v1054_v50 = vunpack.c.l.bf16 %v1312_v44  ;;  %v227_v16 = vld [vmem:[%s1745_s1 + $0x28] sm:$0xff]  ;;  %v226_v19 = vld [vmem:[%s1745_s1 + $0x20] sm:$0xff]  ;;  %v1334_v22 = vld [vmem:[%s1746_s2 + $0xb8] sm:$0xff]  }
   0xa   :  { %180 = vmatpush.msra.mxu2 %v1075_v17  ;;  %202 = vmatpush.msra.mxu3 %v1110_v18  ;;  %v1087_v51 = vunpack.c.h.bf16 %v1320_v49  ;;  %v1051_v53 = vunpack.c.h.bf16 %v1049_v52  ;;  %v1086_v54 = vunpack.c.l.bf16 %v1320_v49  ;;  %v1050_v56 = vunpack.c.l.bf16 %v1049_v52  ;;  %v1332_v32 = vld [vmem:[%s1746_s2 + $0xa8] sm:$0xff]   ;;  %v1331_v38 = vld [vmem:[%s1746_s2 + $0xa0] sm:$0xff]   ;;  %v1330_v44 = vld [vmem:[%s1746_s2 + $0x98] sm:$0xff]  }
   0xb   :  { %v1083_v57 = vunpack.c.h.bf16 %v1319_v55  ;;  %v1082_v58 = vunpack.c.l.bf16 %v1319_v55  ;;  %v236_v60 = vunpack.c.l.bf16 %v229_v59  ;;  %v46_v62 = vperm.slane %v23_v61, 0  ;;  %v1337_v52 = vld [vmem:[%s1746_s2 + $0xd0] sm:$0xff]  }
   0xc   :  { %181 = vmatpush.msra.mxu2 %v1074_v20  ;;  %203 = vmatpush.msra.mxu3 %v1107_v21  ;;  %v47_v63 = vperm.slane %v23_v61, 1  ;;  %v237_v12 = vunpack.c.h.bf16 %v229_v59  ;;  %v234_v14 = vunpack.c.l.bf16 %v228_v13  ;;  %v235_v15 = vunpack.c.h.bf16 %v228_v13  ;;  %v1328_v61 = vld [vmem:[%s1746_s2 + $0x88] sm:$0xff]  }
   0xd   :  { %262 = vmatpush.msrb.mxu0 %v236_v60  ;;  %v232_v17 = vunpack.c.l.bf16 %v227_v16  ;;  %v233_v18 = vunpack.c.h.bf16 %v227_v16  ;;  %v230_v20 = vunpack.c.l.bf16 %v226_v19  ;;  %v231_v21 = vunpack.c.h.bf16 %v226_v19  ;;  %v1012_v19 = vld [vmem:[%s1748_s5 + $0x1] ss:$8 sm:$0x3] }
   0xe   :  { %182 = vmatpush.msra.mxu2 %v1071_v23  ;;  %204 = vmatpush.msra.mxu3 %v1106_v24  ;;  %v1342_v23 = vld [vmem:[%s1746_s2 + $0xf8] sm:$0xff]   ;;  %v1333_v24 = vld [vmem:[%s1746_s2 + $0xb0] sm:$0xff]   ;;  %v1143_v25 = vunpack.c.h.bf16 %v1334_v22  ;;  %v1127_v49 = vunpack.c.h.bf16 %v1330_v44  ;;  %v1126_v55 = vunpack.c.l.bf16 %v1330_v44  ;;  %v1155_v59 = vunpack.c.h.bf16 %v1337_v52 }
   0xf   :  { %285 = vmatpush.msrb.mxu1 %v237_v12  ;;  %263 = vmatpush.msrb.mxu0 %v234_v14  ;;  %v1174_v28 = vunpack.c.l.bf16 %v1342_v23  ;;  %v1335_v12 = vld [vmem:[%s1746_s2 + $0xc0] sm:$0xff]   ;;  %vm581_vm12 = vcmask 44032   ;;  %vm577_vm13 = vcmask 48128   ;;  %vm627_vm14 = vcmask 1045504  }
  0x10   :  { %183 = vmatpush.msra.mxu2 %v1070_v26  ;;  %205 = vmatpush.msra.mxu3 %v1103_v27  ;;  %v1175_v26 = vunpack.c.h.bf16 %v1342_v23  ;;  %v1142_v27 = vunpack.c.l.bf16 %v1334_v22  ;;  %v1147_v14 = vunpack.c.h.bf16 %v1335_v12  ;;  %v1146_v16 = vunpack.c.l.bf16 %v1335_v12 }
  0x11   :  { %1017 = vmatmul.msk.f32.gmra.mxu0 %vm50_vm1, %v35_v29  ;;  %1020 = vmatmul.msk.f32.gmra.mxu1 %vm50_vm1, %v35_v29  ;;  %v1341_v29 = vld [vmem:[%s1746_s2 + $0xf0] sm:$0xff]  }
  0x12   :  { %184 = vmatpush.msra.mxu2 %v1067_v30  ;;  %206 = vmatpush.msra.mxu3 %v1102_v31  ;;  %v1139_v30 = vunpack.c.h.bf16 %v1333_v24  ;;  %v1171_v31 = vunpack.c.h.bf16 %v1341_v29  ;;  %v1170_v35 = vunpack.c.l.bf16 %v1341_v29 }
  0x13   :  { %286 = vmatpush.msrb.mxu1 %v235_v15  ;;  %264 = vmatpush.msrb.mxu0 %v232_v17  ;;  %v1343_v17 = vld [vmem:[%s1749_s3 + $0x8] sm:$0xff]  }
  0x14   :  { %185 = vmatpush.msra.mxu2 %v1066_v33  ;;  %207 = vmatpush.msra.mxu3 %v1099_v34  ;;  %v1340_v33 = vld [vmem:[%s1746_s2 + $0xe8] sm:$0xff]   ;;  %v1138_v34 = vunpack.c.l.bf16 %v1333_v24 }
  0x15   :  { %287 = vmatpush.msrb.mxu1 %v233_v18  ;;  %265 = vmatpush.msrb.mxu0 %v230_v20  ;;  %v1166_v41 = vunpack.c.l.bf16 %v1340_v33  ;;  %v1183_v18 = vunpack.c.h.bf16 %v1343_v17  ;;  %v239_v20 = vperm.slane %v1012_v19, 0 }
  0x16   :  { %186 = vmatpush.msra.mxu2 %v1063_v36  ;;  %208 = vmatpush.msra.mxu3 %v1098_v37  ;;  %v1135_v36 = vunpack.c.h.bf16 %v1332_v32  ;;  %v1167_v37 = vunpack.c.h.bf16 %v1340_v33 }
  0x17   :  { %288 = vmatpush.msrb.mxu1 %v231_v21  ;;  %364 = vmatpush.msra.mxu0 %v1143_v25  ;;  %v240_v21 = vperm.slane %v1012_v19, 1 }
  0x18   :  { %187 = vmatpush.msra.mxu2 %v1062_v39  ;;  %209 = vmatpush.msra.mxu3 %v1095_v40  ;;  %v1339_v39 = vld [vmem:[%s1746_s2 + $0xe0] sm:$0xff]   ;;  %v1134_v40 = vunpack.c.l.bf16 %v1332_v32 }
  0x19   :  { %387 = vmatpush.msra.mxu1 %v1175_v26  ;;  %365 = vmatpush.msra.mxu0 %v1142_v27 }
  0x1a   :  { %188 = vmatpush.msra.mxu2 %v1059_v42  ;;  %210 = vmatpush.msra.mxu3 %v1094_v43  ;;  %v1131_v42 = vunpack.c.h.bf16 %v1331_v38  ;;  %v1163_v43 = vunpack.c.h.bf16 %v1339_v39 }
  0x1b   :  { %388 = vmatpush.msra.mxu1 %v1174_v28  ;;  %366 = vmatpush.msra.mxu0 %v1139_v30 }
  0x1c   :  { %189 = vmatpush.msra.mxu2 %v1058_v45  ;;  %211 = vmatpush.msra.mxu3 %v1091_v46  ;;  %v1338_v45 = vld [vmem:[%s1746_s2 + $0xd8] sm:$0xff]   ;;  %v1130_v46 = vunpack.c.l.bf16 %v1331_v38  ;;  %v31_v38 = vld [vmem:[%s1748_s5 + $0x5] ss:$0 sm:$0xff] }
  0x1d   :  { %389 = vmatpush.msra.mxu1 %v1171_v31  ;;  %367 = vmatpush.msra.mxu0 %v1138_v34  ;;  %v1182_v34 = vunpack.c.l.bf16 %v1343_v17 }
  0x1e   :  { %190 = vmatpush.msra.mxu2 %v1055_v47  ;;  %212 = vmatpush.msra.mxu3 %v1090_v48  ;;  %v1162_v47 = vunpack.c.l.bf16 %v1339_v39  ;;  %v30_v48 = vld [vmem:[%s1748_s5 + $0x4] ss:$0 sm:$0xff] }
  0x1f   :  { %390 = vmatpush.msra.mxu1 %v1170_v35  ;;  %368 = vmatpush.msra.mxu0 %v1135_v36  ;;  %v1177_v35 = vld [vmem:[%s1749_s3] sm:$0xff]  }
  0x20   :  { %191 = vmatpush.msra.mxu2 %v1054_v50  ;;  %213 = vmatpush.msra.mxu3 %v1087_v51  ;;  %v1159_v50 = vunpack.c.h.bf16 %v1338_v45  ;;  %v1329_v51 = vld [vmem:[%s1746_s2 + $0x90] sm:$0xff]   ;;  %v1179_v36 = vunpack.c.h.bf16 %v1177_v35 }
  0x21   :  { %391 = vmatpush.msra.mxu1 %v1167_v37  ;;  %369 = vmatpush.msra.mxu0 %v1134_v40  ;;  %v1178_v37 = vunpack.c.l.bf16 %v1177_v35 }
  0x22   :  { %192 = vmatpush.msra.mxu2 %v1051_v53  ;;  %214 = vmatpush.msra.mxu3 %v1086_v54 }
  0x23   :  { %392 = vmatpush.msra.mxu1 %v1166_v41  ;;  %370 = vmatpush.msra.mxu0 %v1131_v42 }
  0x24   :  { %193 = vmatpush.msra.mxu2 %v1050_v56  ;;  %215 = vmatpush.msra.mxu3 %v1083_v57  ;;  %v1158_v56 = vunpack.c.l.bf16 %v1338_v45 }
  0x25   :  { %393 = vmatpush.msra.mxu1 %v1163_v43  ;;  %371 = vmatpush.msra.mxu0 %v1130_v46 }
  0x26   :  { %216 = vmatpush.msra.mxu3 %v1082_v58  ;;  %v1123_v58 = vunpack.c.h.bf16 %v1329_v51  ;;  %438 = vmatpush.msrb.mxu2 %v1183_v18 }
  0x27   :  { %394 = vmatpush.msra.mxu1 %v1162_v47  ;;  %372 = vmatpush.msra.mxu0 %v1127_v49  ;;  %v1392_v49 = vmov 32  }
  0x28   :  { %439 = vmatpush.msrb.mxu2 %v1182_v34  ;;  %1380 = vset.pattern.permute.xlu1 %v1392_v49 }
  0x29   :  { %395 = vmatpush.msra.mxu1 %v1159_v50  ;;  %373 = vmatpush.msra.mxu0 %v1126_v55  ;;  %v1393_v50 = vmov 33  }
  0x2a   :  { %440 = vmatpush.msrb.mxu2 %v1179_v36  ;;  %1379 = vset.pattern.permute.xlu0 %v1393_v50 }
  0x2b   :  { %396 = vmatpush.msra.mxu1 %v1158_v56  ;;  %374 = vmatpush.msra.mxu0 %v1123_v58  ;;  %v1394_v56 = vmov 6.0  }
  0x2c   :  { %441 = vmatpush.msrb.mxu2 %v1178_v37  ;;  %1382 = vrcp.f32 %v1394_v56  ;;  %v679_v56 = vld [vmem:[%s1745_s1 + $0x50] sm:$0xff] }
  0x2d   :  { %397 = vmatpush.msra.mxu1 %v1155_v59  ;;  %v449_v59 = vlaneseq }
  0x86   :  { %v81_v0 = vpop.f32.mrf.mxu0  ;;  %v104_v1 = vpop.f32.mrf.mxu1 }
  0x87   :  { %v82_v2 = vadd.f32 %v81_v0, %v46_v62  ;;  %v105_v3 = vadd.f32 %v104_v1, %v47_v63  ;;  %v1154_v0 = vunpack.c.l.bf16 %v1337_v52  ;;  %v32_v52 = vld [vmem:[%s1748_s5 + $0x6] ss:$0 sm:$0xff] }
  0x89   :  { %v110_v4 = vmax.f32 %v82_v2, 0.0  ;;  %v111_v5 = vmax.f32 %v105_v3, 0.0  ;;  %v1119_v2 = vunpack.c.h.bf16 %v1328_v61  ;;  %398 = vmatpush.msra.mxu1 %v1154_v0 }
  0x8b   :  { %194 = vmatmul.f32.vlgmr.msra.gmra.mxu2 %v110_v4  ;;  %217 = vmatmul.f32.vlgmr.msra.gmra.mxu3 %v111_v5 }
  0x8e   :  { %v84_v6 = vpop.f32.mrf.mxu0  ;;  %v107_v7 = vpop.f32.mrf.mxu1 }
  0x8f   :  { %v85_v8 = vadd.f32 %v84_v6, %v46_v62  ;;  %v108_v9 = vadd.f32 %v107_v7, %v47_v63  ;;  %v1336_v62 = vld [vmem:[%s1746_s2 + $0xc8] sm:$0xff]   ;;  %v1122_v63 = vunpack.c.l.bf16 %v1329_v51 }
  0x90   :  { %v1151_v3 = vunpack.c.h.bf16 %v1336_v62 }
  0x91   :  { %v112_v10 = vmax.f32 %v85_v8, 0.0  ;;  %v113_v11 = vmax.f32 %v108_v9, 0.0  ;;  %375 = vmatpush.msra.mxu0 %v1122_v63  ;;  %v1118_v9 = vunpack.c.l.bf16 %v1328_v61  ;;  %v450_v61 = vshrl.u32 %v449_v59, 7 }
  0x92   :  { %399 = vmatpush.msra.mxu1 %v1151_v3 }
  0x93   :  { %197 = vmatmul.f32.gmra.mxu2 %v112_v10  ;;  %220 = vmatmul.f32.gmra.mxu3 %v113_v11  ;;  %v1150_v10 = vunpack.c.l.bf16 %v1336_v62  ;;  %v1327_v11 = vld [vmem:[%s1746_s2 + $0x80] sm:$0xff]   ;;  %v451_v63 = vadd.s32 8, %v450_v61 }
  0x94   :  { %376 = vmatpush.msra.mxu0 %v1119_v2  ;;  %v1115_v13 = vunpack.c.h.bf16 %v1327_v11  ;;  %v1114_v15 = vunpack.c.l.bf16 %v1327_v11 }
  0x95   :  { %400 = vmatpush.msra.mxu1 %v1150_v10 }
  0x96   :  { %377 = vmatpush.msra.mxu0 %v1118_v9 }
  0x97   :  { %401 = vmatpush.msra.mxu1 %v1147_v14 }
  0x98   :  { %378 = vmatpush.msra.mxu0 %v1115_v13  ;;  %v1395_v13 = vmov 0.0  }
  0x99   :  { %402 = vmatpush.msra.mxu1 %v1146_v16 }
  0x9a   :  { %379 = vmatpush.msra.mxu0 %v1114_v15 }
 0x10e   :  { %v195_v53 = vpop.f32.mrf.mxu2  ;;  %v218_v54 = vpop.f32.mrf.mxu3 }
 0x10f   :  { %v196_v57 = vadd.f32 %v195_v53, %v30_v48 }
 0x111   :  { %v219_v60 = vadd.f32 %v218_v54, %v196_v57  ;;  %v1383_v57 = vpop.eup %1382 }
 0x112   :  { %v455_v58 = vmul.f32 6.0, %v1383_v57  ;;  %vm459_vm3 = vweird.f32 %v1383_v57 }
 0x113   :  { %v224_v1 = vmax.f32 %v219_v60, 0.0 }
 0x114   :  { %v456_v60 = vsub.f32 1.0, %v455_v58 }
 0x115   :  { %1021 = vmatmul.msk.f32.vlgmr.msrb.gmra.mxu0 %vm243_vm2, %v224_v1  ;;  %1023 = vmatmul.msk.f32.vlgmr.msrb.gmra.mxu1 %vm243_vm2, %v224_v1  ;;  %v453_v1 = vcvt.s32.f32 %v451_v63 }
 0x116   :  { %v198_v4 = vpop.f32.mrf.mxu2  ;;  %v221_v5 = vpop.f32.mrf.mxu3  ;;  %v457_v62 = vmul.f32 %v1383_v57, %v456_v60  ;;  %v685_v60 = vunpack.c.l.bf16 %v679_v56 }
 0x117   :  { %v199_v6 = vadd.f32 %v198_v4, %v30_v48  ;;  %v1588_v4 = vcvt.s32.f32 %v450_v61  ;;  %v686_v61 = vunpack.c.h.bf16 %v679_v56 }
 0x118   :  { %v458_v0 = vadd.f32 %v1383_v57, %v457_v62 }
 0x119   :  { %v222_v7 = vadd.f32 %v221_v5, %v199_v6 }
 0x11a   :  { %v460_v2 = vsel %vm459_vm3, %v1383_v57, %v458_v0  ;;  %v678_v57 = vld [vmem:[%s1745_s1 + $0x48] sm:$0xff] }
 0x11b   :  { %v225_v8 = vmax.f32 %v222_v7, 0.0  ;;  %v462_v3 = vmul.f32 %v460_v2, %v453_v1  ;;  %v470_v7 = vand.u32 127, %v449_v59  ;;  %v683_v62 = vunpack.c.l.bf16 %v678_v57 }
 0x11d   :  { %1022 = vmatmul.msk.f32.gmra.mxu0 %vm243_vm2, %v225_v8  ;;  %1024 = vmatmul.msk.f32.gmra.mxu1 %vm243_vm2, %v225_v8  ;;  %v464_v5 = vfloor.f32 %v462_v3  ;;  %v461_v8 = vmul.f32 %v460_v2, %v1588_v4  ;;  %v471_v10 = vcvt.s32.f32 %v470_v7  ;;  %v740_v7 = vld [vmem:[%s1745_s1 + $0x68] sm:$0xff] }
 0x11f   :  { %v466_v6 = vmul.f32 6.0, %v464_v5  ;;  %v463_v11 = vfloor.f32 %v461_v8  ;;  %v478_v15 = vmul.f32 %v471_v10, %v460_v2  ;;  %vm489_vm11 = vcmp.eq.f32.partialorder %v464_v5, %v471_v10 }
 0x120   :  { %v684_v8 = vunpack.c.h.bf16 %v678_v57 }
 0x121   :  { %v468_v9 = vsub.f32 %v453_v1, %v466_v6  ;;  %v465_v12 = vmul.f32 6.0, %v463_v11  ;;  %v479_v19 = vfloor.f32 %v478_v15  ;;  %vm488_vm8 = vcmp.eq.f32.partialorder %v463_v11, %v471_v10  ;;  %v742_v1 = vld [vmem:[%s1745_s1 + $0x78] sm:$0xff]  ;;  %v677_v11 = vld [vmem:[%s1745_s1 + $0x40] sm:$0xff] }
 0x122   :  { %v749_v2 = vunpack.c.l.bf16 %v742_v1  ;;  %v750_v3 = vunpack.c.h.bf16 %v742_v1  ;;  %v1370_v1 = vld [vmem:[%s1750_s4 + $0xd8] sm:$0xff]  }
 0x123   :  { %vm473_vm4 = vcmp.eq.f32.partialorder %v468_v9, %v471_v10  ;;  %v467_v16 = vsub.f32 %v1588_v4, %v465_v12  ;;  %vm485_vm6 = vcmp.eq.f32.partialorder %v479_v19, %v1588_v4  ;;  %v745_v9 = vunpack.c.l.bf16 %v740_v7  ;;  %v739_v12 = vld [vmem:[%s1745_s1 + $0x60] sm:$0xff] }
 0x124   :  { %v1028_v14 = vsel %vm473_vm4, 1.0, %v1395_v13  ;;  %v743_v15 = vunpack.c.l.bf16 %v739_v12 }
 0x125   :  { %vm472_vm5 = vcmp.eq.f32.partialorder %v467_v16, %v471_v10  ;;  %v744_v16 = vunpack.c.h.bf16 %v739_v12 }
 0x192   :  { %v267_v22 = vpop.f32.mrf.mxu0  ;;  %v290_v23 = vpop.f32.mrf.mxu1 }
 0x193   :  { %v268_v24 = vadd.f32 %v267_v22, %v239_v20  ;;  %v291_v25 = vadd.f32 %v290_v23, %v240_v21  ;;  %v1594_v23 = vsel %vm485_vm6, 1.0, %v1395_v13 }
 0x195   :  { %v296_v26 = vmax.f32 %v268_v24, 0.0  ;;  %v297_v27 = vmax.f32 %v291_v25, 0.0  ;;  %v1031_v24 = vsel %vm488_vm8, 1.0, %v1395_v13 }
 0x197   :  { %380 = vmatmul.f32.vlgmr.msra.gmra.mxu0 %v296_v26  ;;  %403 = vmatmul.f32.vlgmr.msra.gmra.mxu1 %v297_v27  ;;  %v1032_v26 = vsel %vm489_vm11, 1.0, %v1395_v13 }
 0x19a   :  { %v270_v28 = vpop.f32.mrf.mxu0  ;;  %v293_v29 = vpop.f32.mrf.mxu1 }
 0x19b   :  { %v271_v30 = vadd.f32 %v270_v28, %v239_v20  ;;  %v294_v31 = vadd.f32 %v293_v29, %v240_v21  ;;  %v1027_v20 = vsel %vm472_vm5, 1.0, %v1395_v13 }
 0x19d   :  { %v298_v32 = vmax.f32 %v271_v30, 0.0  ;;  %v299_v33 = vmax.f32 %v294_v31, 0.0 }
 0x19f   :  { %383 = vmatmul.f32.gmra.mxu0 %v298_v32  ;;  %406 = vmatmul.f32.gmra.mxu1 %v299_v33 }
 0x214   :  { %v381_v39 = vpop.f32.mrf.mxu0  ;;  %v404_v40 = vpop.f32.mrf.mxu1 }
 0x215   :  { %v382_v41 = vadd.f32 %v381_v39, %v31_v38 }
 0x217   :  { %v405_v42 = vadd.f32 %v404_v40, %v382_v41 }
 0x219   :  { %v410_v43 = vmax.f32 %v405_v42, 0.0 }
 0x21b   :  { %1025 = vmatmul.msk.f32.vlgmr.msrb.gmra.mxu2 %vm243_vm2, %v410_v43 }
 0x21c   :  { %v384_v44 = vpop.f32.mrf.mxu0  ;;  %v407_v46 = vpop.f32.mrf.mxu1 }
 0x21d   :  { %v385_v45 = vadd.f32 %v384_v44, %v31_v38 }
 0x21f   :  { %v408_v47 = vadd.f32 %v407_v46, %v385_v45  ;;  %v480_v45 = vmul.f32 6.0, %v479_v19  ;;  %v1374_v19 = vld [vmem:[%s1750_s4 + $0xf8] sm:$0xff]  }
 0x221   :  { %v411_v48 = vmax.f32 %v408_v47, 0.0  ;;  %v481_v46 = vsub.f32 %v471_v10, %v480_v45  ;;  %v746_v10 = vunpack.c.h.bf16 %v740_v7  ;;  %v1295_v7 = vunpack.c.h.bf16 %v1370_v1 }
 0x223   :  { %1026 = vmatmul.msk.f32.gmra.mxu2 %vm243_vm2, %v411_v48  ;;  %vm482_vm15 = vcmp.eq.f32.partialorder %v481_v46, %v1588_v4  ;;  %v741_v4 = vld [vmem:[%s1745_s1 + $0x70] sm:$0xff] }
 0x224   :  { %v1029_v47 = vsel %vm482_vm15, 1.0, %v1395_v13  ;;  %v747_v5 = vunpack.c.l.bf16 %v741_v4  ;;  %v748_v6 = vunpack.c.h.bf16 %v741_v4  ;;  %v681_v13 = vunpack.c.l.bf16 %v677_v11 }
 0x225   :  { %1040 = vmatpush.msk.msrb.mxu0 %vm627_vm14, %v1029_v47 }
 0x227   :  { %768 = vmatpush.msra.mxu0 %v749_v2  ;;  %v1354_v2 = vld [vmem:[%s1750_s4 + $0x58] sm:$0xff]  }
 0x229   :  { %769 = vmatpush.msra.mxu0 %v747_v5 }
 0x22b   :  { %770 = vmatpush.msra.mxu0 %v745_v9  ;;  %v1345_v9 = vld [vmem:[%s1750_s4 + $0x10] sm:$0xff]  }
 0x22d   :  { %771 = vmatpush.msra.mxu0 %v743_v15  ;;  %v1294_v15 = vunpack.c.l.bf16 %v1370_v1 }
 0x29e   :  { %v443_v51 = vpop.f32.mrf.mxu2 }
 0x29f   :  { %v444_v55 = vadd.f32 %v443_v51, %v32_v52 }
 0x2a6   :  { %v446_v53 = vpop.f32.mrf.mxu2 }
 0x2a7   :  { %v447_v54 = vadd.f32 %v446_v53, %v32_v52 }
 0x2a9   :  { %572 = vperm.xlu1 %1380, %v447_v54   ;;  %501 = vperm.xlu0 %1379, %v447_v54  }
 0x2aa   :  { %1042 = vmatpush.msk.msrb.mxu1 %vm57_vm0, %v447_v54 }
 0x2ac   :  { %672 = vmatpush.msrb.mxu1 %v444_v55 }
 0x2ae   :  { %788 = vmatpush.msra.mxu1 %v750_v3 }
 0x2b0   :  { %789 = vmatpush.msra.mxu1 %v748_v6 }
 0x2b1   :  { %568 = vperm.xlu1 %1380, %v444_v55   ;;  %496 = vperm.xlu0 %1379, %v444_v55   ;;  %v680_v55 = vld [vmem:[%s1745_s1 + $0x58] sm:$0xff] }
 0x2b2   :  { %v687_v58 = vunpack.c.l.bf16 %v680_v55  ;;  %v688_v59 = vunpack.c.h.bf16 %v680_v55  ;;  %790 = vmatpush.msra.mxu1 %v746_v10  ;;  %v1361_v10 = vld [vmem:[%s1750_s4 + $0x90] sm:$0xff]  }
 0x2b4   :  { %791 = vmatpush.msra.mxu1 %v744_v16  ;;  %v1230_v16 = vunpack.c.l.bf16 %v1354_v2 }
 0x2b9   :  { %1381 = vset.pattern.permute.xlu0 %v1392_v49 }
 0x31b   :  { %v502_v17 = vpop.permute.xlu0 %501  ;;  %v573_v28 = vpop.permute.xlu1 %572 }
 0x31c   :  { %v505_v18 = vmul.f32 %v1028_v14, %v502_v17  ;;  %v682_v14 = vunpack.c.h.bf16 %v677_v11  ;;  %v1350_v17 = vld [vmem:[%s1750_s4 + $0x38] sm:$0xff]  }
 0x31e   :  { %1033 = vmatpush.msk.msrb.mxu3 %vm57_vm0, %v505_v18  ;;  %v1366_v18 = vld [vmem:[%s1750_s4 + $0xb8] sm:$0xff]  }
 0x323   :  { %v497_v21 = vpop.permute.xlu0 %496  ;;  %v569_v32 = vpop.permute.xlu1 %568 }
 0x324   :  { %v504_v22 = vmul.f32 %v1027_v20, %v497_v21  ;;  %v1215_v20 = vunpack.c.h.bf16 %v1350_v17  ;;  %v1279_v21 = vunpack.c.h.bf16 %v1366_v18 }
 0x326   :  { %528 = vmatpush.msrb.mxu3 %v504_v22  ;;  %v1311_v22 = vunpack.c.h.bf16 %v1374_v19 }
 0x327   :  { %1034 = vmatmul.msk.f32.vlgmr.msrb.gmra.mxu3 %vm506_vm7, %v1594_v23 }
 0x3aa   :  { %v530_v25 = vpop.f32.mrf.mxu3 }
 0x3ab   :  { %1035 = vmatpush.msk.msra.mxu3 %vm540_vm9, %v530_v25  ;;  %v1349_v25 = vld [vmem:[%s1750_s4 + $0x30] sm:$0xff]  }
 0x3ac   :  { %1036 = vmatmul.msk.f32.vlgmr.msra.gmra.mxu3 %vm533_vm10, %v1031_v24  ;;  %v1358_v24 = vld [vmem:[%s1750_s4 + $0x78] sm:$0xff]  }
 0x3ad   :  { %729 = vmatpush.msrb.mxu3 %v688_v59 }
 0x3af   :  { %730 = vmatpush.msrb.mxu3 %v686_v61  ;;  %v1346_v61 = vld [vmem:[%s1750_s4 + $0x18] sm:$0xff]  }
 0x3b0   :  { %v1199_v5 = vunpack.c.h.bf16 %v1346_v61  ;;  %v1198_v11 = vunpack.c.l.bf16 %v1346_v61 }
 0x3b1   :  { %731 = vmatpush.msrb.mxu3 %v684_v8  ;;  %v1231_v8 = vunpack.c.h.bf16 %v1354_v2 }
 0x3b3   :  { %732 = vmatpush.msrb.mxu3 %v682_v14  ;;  %v1353_v14 = vld [vmem:[%s1750_s4 + $0x50] sm:$0xff]  }
 0x3b4   :  { %1037 = vmatmul.msk.f32.gmra.mxu3 %vm533_vm10, %v1032_v26  ;;  %v1365_v26 = vld [vmem:[%s1750_s4 + $0xb0] sm:$0xff]  }
 0x42f   :  { %v561_v27 = vpop.f32.mrf.mxu3 }
 0x430   :  { %v575_v33 = vmul.f32 %v569_v32, %v561_v27  ;;  %v1247_v27 = vunpack.c.h.bf16 %v1358_v24  ;;  %v1211_v32 = vunpack.c.h.bf16 %v1349_v25 }
 0x432   :  { %v578_v34 = vsel %vm577_vm13, %v575_v33, -inf  ;;  %946 = vmatpush.msra.mxu3 %v1247_v27  ;;  %v1226_v27 = vunpack.c.l.bf16 %v1353_v14 }
 0x437   :  { %v564_v29 = vpop.f32.mrf.mxu3 }
 0x438   :  { %v576_v30 = vmul.f32 %v573_v28, %v564_v29  ;;  %v1278_v28 = vunpack.c.l.bf16 %v1366_v18  ;;  %v1310_v29 = vunpack.c.l.bf16 %v1374_v19  ;;  %v1259_v18 = vunpack.c.h.bf16 %v1361_v10 }
 0x43a   :  { %v582_v31 = vsel %vm581_vm12, %v576_v30, -inf }
 0x43b   :  { %583 = vmax.xlane.f32.xlu2 %v582_v31  ;;  %v1357_v31 = vld [vmem:[%s1750_s4 + $0x70] sm:$0xff]  }
 0x443   :  { %579 = vmax.xlane.f32.xlu2 %v578_v34  ;;  %v1275_v34 = vunpack.c.h.bf16 %v1365_v26 }
 0x4ae   :  { %v584_v35 = vpop.xlane.xlu2 %583 }
 0x4af   :  { %v586_v36 = vsub.f32 %v576_v30, %v584_v35  ;;  %v1373_v30 = vld [vmem:[%s1750_s4 + $0xf0] sm:$0xff]  }
 0x4b0   :  { %v1307_v35 = vunpack.c.h.bf16 %v1373_v30 }
 0x4b1   :  { %v589_v37 = vmul.f32 1.442695, %v586_v36  ;;  %v1243_v36 = vunpack.c.h.bf16 %v1357_v31 }
 0x4b3   :  { %1384 = vpow2.f32 %v589_v37  ;;  %v1348_v37 = vld [vmem:[%s1750_s4 + $0x28] sm:$0xff]  }
 0x4b4   :  { %v1207_v45 = vunpack.c.h.bf16 %v1348_v37 }
 0x4b6   :  { %v580_v38 = vpop.xlane.xlu2 %579 }
 0x4b7   :  { %v585_v39 = vsub.f32 %v575_v33, %v580_v38  ;;  %v1246_v33 = vunpack.c.l.bf16 %v1358_v24  ;;  %v1364_v38 = vld [vmem:[%s1750_s4 + $0xa8] sm:$0xff]   ;;  %v1258_v24 = vunpack.c.l.bf16 %v1361_v10 }
 0x4b8   :  { %v1271_v46 = vunpack.c.h.bf16 %v1364_v38 }
 0x4b9   :  { %v1385_v40 = vpop.eup %1384  ;;  %v587_v41 = vmul.f32 1.442695, %v585_v39  ;;  %v1210_v39 = vunpack.c.l.bf16 %v1349_v25  ;;  %947 = vmatpush.msra.mxu3 %v1246_v33  ;;  %v1368_v25 = vld [vmem:[%s1750_s4 + $0xc8] sm:$0xff]  }
 0x4ba   :  { %v594_v42 = vsel %vm581_vm12, %v1385_v40, 0.0  ;;  %v1286_v33 = vunpack.c.l.bf16 %v1368_v25 }
 0x4bb   :  { %1386 = vpow2.f32 %v587_v41  ;;  %595 = vadd.xlane.f32.xlu0 %v594_v42  ;;  %v1372_v41 = vld [vmem:[%s1750_s4 + $0xe8] sm:$0xff]   ;;  %948 = vmatpush.msra.mxu3 %v1243_v36 }
 0x4bc   :  { %v1356_v42 = vld [vmem:[%s1750_s4 + $0x68] sm:$0xff]   ;;  %v1303_v47 = vunpack.c.h.bf16 %v1372_v41  ;;  %v1302_v55 = vunpack.c.l.bf16 %v1372_v41 }
 0x4bd   :  { %v1238_v56 = vunpack.c.l.bf16 %v1356_v42 }
 0x4c1   :  { %v1387_v43 = vpop.eup %1386 }
 0x4c2   :  { %v591_v44 = vsel %vm577_vm13, %v1387_v43, 0.0 }
 0x4c3   :  { %592 = vadd.xlane.f32.xlu1 %v591_v44  ;;  %v1242_v44 = vunpack.c.l.bf16 %v1357_v31 }
 0x4c5   :  { %949 = vmatpush.msra.mxu3 %v1242_v44  ;;  %v1185_v44 = vld [vmem:[%s1750_s4] sm:$0xff]  }
 0x52e   :  { %v596_v48 = vpop.xlane.xlu0 %595 }
 0x52f   :  { %1388 = vrcp.f32 %v596_v48  ;;  %v1239_v48 = vunpack.c.h.bf16 %v1356_v42 }
 0x531   :  { %950 = vmatpush.msra.mxu3 %v1239_v48  ;;  %v1186_v48 = vunpack.c.l.bf16 %v1185_v44 }
 0x533   :  { %951 = vmatpush.msra.mxu3 %v1238_v56 }
 0x535   :  { %v1389_v49 = vpop.eup %1388 }
 0x536   :  { %v600_v50 = vmul.f32 %v1389_v49, %v1385_v40  ;;  %v593_v51 = vpop.xlane.xlu1 %592  ;;  %v1274_v40 = vunpack.c.l.bf16 %v1365_v26  ;;  %v1347_v49 = vld [vmem:[%s1750_s4 + $0x20] sm:$0xff]  }
 0x537   :  { %1390 = vrcp.f32 %v593_v51  ;;  %v1206_v51 = vunpack.c.l.bf16 %v1348_v37  ;;  %v1203_v57 = vunpack.c.h.bf16 %v1347_v49 }
 0x538   :  { %1038 = vmatpush.msk.msra.mxu2 %vm57_vm0, %v600_v50  ;;  %v1363_v50 = vld [vmem:[%s1750_s4 + $0xa0] sm:$0xff]   ;;  %vm1006_vm0 = vcmask 9216  }
 0x53d   :  { %v1391_v52 = vpop.eup %1390 }
 0x53e   :  { %v599_v53 = vmul.f32 %v1391_v52, %v1387_v43  ;;  %v1306_v43 = vunpack.c.l.bf16 %v1373_v30  ;;  %v1270_v52 = vunpack.c.l.bf16 %v1364_v38  ;;  %v1287_v30 = vunpack.c.h.bf16 %v1368_v25  ;;  %v1352_v38 = vld [vmem:[%s1750_s4 + $0x48] sm:$0xff]  }
 0x540   :  { %619 = vmatpush.msra.mxu2 %v599_v53  ;;  %v1371_v53 = vld [vmem:[%s1750_s4 + $0xe0] sm:$0xff]  }
 0x541   :  { %1039 = vmatmul.msk.f32.vlgmr.msra.gmra.mxu2 %vm506_vm7, %v1594_v23  ;;  %v1299_v59 = vunpack.c.h.bf16 %v1371_v53  ;;  %v1298_v3 = vunpack.c.l.bf16 %v1371_v53  ;;  %v1013_v53 = vld [vmem:[%s1748_s5 + $0x2] ss:$8 sm:$0x3] }
 0x542   :  { %709 = vmatpush.msrb.mxu2 %v687_v58  ;;  %v1267_v58 = vunpack.c.h.bf16 %v1363_v50 }
 0x544   :  { %710 = vmatpush.msrb.mxu2 %v685_v60 }
 0x546   :  { %711 = vmatpush.msrb.mxu2 %v683_v62  ;;  %v1362_v62 = vld [vmem:[%s1750_s4 + $0x98] sm:$0xff]  }
 0x547   :  { %v1263_v6 = vunpack.c.h.bf16 %v1362_v62  ;;  %v1262_v12 = vunpack.c.l.bf16 %v1362_v62 }
 0x548   :  { %712 = vmatpush.msrb.mxu2 %v681_v13  ;;  %v1369_v13 = vld [vmem:[%s1750_s4 + $0xd0] sm:$0xff]  }
 0x549   :  { %v1291_v19 = vunpack.c.h.bf16 %v1369_v13  ;;  %v1290_v26 = vunpack.c.l.bf16 %v1369_v13 }
 0x54a   :  { %926 = vmatpush.msra.mxu2 %v1215_v20  ;;  %v1227_v20 = vunpack.c.h.bf16 %v1353_v14 }
 0x5c4   :  { %v621_v54 = vpop.f32.mrf.mxu2 }
 0x5c5   :  { %1041 = vmatmul.msk.f32.vlgmr.msrb.gmra.mxu0 %vm577_vm13, %v621_v54  ;;  %v1355_v54 = vld [vmem:[%s1750_s4 + $0x60] sm:$0xff]  }
 0x5c6   :  { %966 = vmatpush.msrb.mxu0 %v1279_v21  ;;  %v1235_v60 = vunpack.c.h.bf16 %v1355_v54  ;;  %v1234_v4 = vunpack.c.l.bf16 %v1355_v54  ;;  %v1344_v21 = vld [vmem:[%s1750_s4 + $0x8] sm:$0xff]  }
 0x5c7   :  { %v1190_v42 = vunpack.c.l.bf16 %v1344_v21 }
 0x5c8   :  { %967 = vmatpush.msrb.mxu0 %v1278_v28  ;;  %952 = vmatpush.msra.mxu3 %v1235_v60  ;;  %v1191_v28 = vunpack.c.h.bf16 %v1344_v21 }
 0x5ca   :  { %968 = vmatpush.msrb.mxu0 %v1275_v34  ;;  %953 = vmatpush.msra.mxu3 %v1234_v4  ;;  %v1359_v34 = vld [vmem:[%s1750_s4 + $0x80] sm:$0xff]  }
 0x5cb   :  { %v1251_v36 = vunpack.c.h.bf16 %v1359_v34  ;;  %v33_v4 = vld [vmem:[%s1748_s5 + $0x7] ss:$0 sm:$0xff] }
 0x5cc   :  { %969 = vmatpush.msrb.mxu0 %v1274_v40  ;;  %954 = vmatpush.msra.mxu3 %v1231_v8  ;;  %v1250_v40 = vunpack.c.l.bf16 %v1359_v34 }
 0x5ce   :  { %970 = vmatpush.msrb.mxu0 %v1271_v46  ;;  %955 = vmatpush.msra.mxu3 %v1230_v16  ;;  %v1187_v46 = vunpack.c.h.bf16 %v1185_v44 }
 0x5d0   :  { %971 = vmatpush.msrb.mxu0 %v1270_v52  ;;  %956 = vmatpush.msra.mxu3 %v1227_v20 }
 0x5d2   :  { %972 = vmatpush.msrb.mxu0 %v1267_v58  ;;  %957 = vmatpush.msra.mxu3 %v1226_v27  ;;  %v690_v58 = vperm.slane %v1013_v53, 0 }
 0x642   :  { %v648_v63 = vpop.f32.mrf.mxu0 }
 0x643   :  { %v651_v0 = vmul.f32 %v1594_v23, %v648_v63  ;;  %v1214_v23 = vunpack.c.l.bf16 %v1350_v17  ;;  %v1202_v63 = vunpack.c.l.bf16 %v1347_v49  ;;  %v1195_v17 = vunpack.c.h.bf16 %v1345_v9 }
 0x645   :  { %1043 = vmatmul.msk.f32.vlgmr.msrb.gmra.mxu1 %vm506_vm7, %v651_v0  ;;  %927 = vmatpush.msra.mxu2 %v1214_v23  ;;  %v1266_v0 = vunpack.c.l.bf16 %v1363_v50  ;;  %v1194_v23 = vunpack.c.l.bf16 %v1345_v9  ;;  %v1014_v50 = vld [vmem:[%s1748_s5 + $0x3] ss:$8 sm:$0x3] }
 0x646   :  { %986 = vmatpush.msrb.mxu1 %v1311_v22  ;;  %v1360_v22 = vld [vmem:[%s1750_s4 + $0x88] sm:$0xff]   ;;  %v753_v52 = vperm.slane %v1014_v50, 1 }
 0x647   :  { %928 = vmatpush.msra.mxu2 %v1211_v32  ;;  %973 = vmatpush.msrb.mxu0 %v1266_v0  ;;  %v1254_v32 = vunpack.c.l.bf16 %v1360_v22 }
 0x648   :  { %987 = vmatpush.msrb.mxu1 %v1310_v29  ;;  %v1255_v29 = vunpack.c.h.bf16 %v1360_v22 }
 0x649   :  { %929 = vmatpush.msra.mxu2 %v1210_v39  ;;  %974 = vmatpush.msrb.mxu0 %v1263_v6  ;;  %v1223_v39 = vunpack.c.h.bf16 %v1352_v38 }
 0x64a   :  { %988 = vmatpush.msrb.mxu1 %v1307_v35  ;;  %v1367_v35 = vld [vmem:[%s1750_s4 + $0xc0] sm:$0xff]  }
 0x64b   :  { %930 = vmatpush.msra.mxu2 %v1207_v45  ;;  %975 = vmatpush.msrb.mxu0 %v1262_v12  ;;  %v1283_v37 = vunpack.c.h.bf16 %v1367_v35  ;;  %v1282_v41 = vunpack.c.l.bf16 %v1367_v35  ;;  %v1351_v45 = vld [vmem:[%s1750_s4 + $0x40] sm:$0xff]  }
 0x64c   :  { %989 = vmatpush.msrb.mxu1 %v1306_v43  ;;  %958 = vmatpush.msra.mxu3 %v1223_v39  ;;  %v1222_v43 = vunpack.c.l.bf16 %v1352_v38  ;;  %v1218_v49 = vunpack.c.l.bf16 %v1351_v45 }
 0x64d   :  { %931 = vmatpush.msra.mxu2 %v1206_v51  ;;  %976 = vmatpush.msrb.mxu0 %v1259_v18  ;;  %v752_v51 = vperm.slane %v1014_v50, 0 }
 0x64e   :  { %990 = vmatpush.msrb.mxu1 %v1303_v47  ;;  %959 = vmatpush.msra.mxu3 %v1222_v43  ;;  %v1219_v47 = vunpack.c.h.bf16 %v1351_v45 }
 0x64f   :  { %932 = vmatpush.msra.mxu2 %v1203_v57  ;;  %977 = vmatpush.msrb.mxu0 %v1258_v24 }
 0x650   :  { %991 = vmatpush.msrb.mxu1 %v1302_v55  ;;  %960 = vmatpush.msra.mxu3 %v1219_v47 }
 0x651   :  { %933 = vmatpush.msra.mxu2 %v1202_v63  ;;  %978 = vmatpush.msrb.mxu0 %v1255_v29 }
 0x652   :  { %992 = vmatpush.msrb.mxu1 %v1299_v59  ;;  %961 = vmatpush.msra.mxu3 %v1218_v49  ;;  %v691_v59 = vperm.slane %v1013_v53, 1 }
 0x653   :  { %934 = vmatpush.msra.mxu2 %v1199_v5  ;;  %979 = vmatpush.msrb.mxu0 %v1254_v32 }
 0x654   :  { %993 = vmatpush.msrb.mxu1 %v1298_v3 }
 0x655   :  { %935 = vmatpush.msra.mxu2 %v1198_v11  ;;  %980 = vmatpush.msrb.mxu0 %v1251_v36 }
 0x656   :  { %994 = vmatpush.msrb.mxu1 %v1295_v7 }
 0x657   :  { %936 = vmatpush.msra.mxu2 %v1195_v17  ;;  %981 = vmatpush.msrb.mxu0 %v1250_v40 }
 0x658   :  { %995 = vmatpush.msrb.mxu1 %v1294_v15 }
 0x659   :  { %937 = vmatpush.msra.mxu2 %v1194_v23 }
 0x65a   :  { %996 = vmatpush.msrb.mxu1 %v1291_v19 }
 0x65b   :  { %938 = vmatpush.msra.mxu2 %v1191_v28 }
 0x65c   :  { %997 = vmatpush.msrb.mxu1 %v1290_v26 }
 0x65d   :  { %939 = vmatpush.msra.mxu2 %v1190_v42 }
 0x65e   :  { %998 = vmatpush.msrb.mxu1 %v1287_v30 }
 0x65f   :  { %940 = vmatpush.msra.mxu2 %v1187_v46 }
 0x660   :  { %999 = vmatpush.msrb.mxu1 %v1286_v33 }
 0x661   :  { %941 = vmatpush.msra.mxu2 %v1186_v48 }
 0x662   :  { %1000 = vmatpush.msrb.mxu1 %v1283_v37 }
 0x664   :  { %1001 = vmatpush.msrb.mxu1 %v1282_v41 }
 0x6c2   :  { %v674_v31 = vpop.f32.mrf.mxu1 }
 0x6c3   :  { %1044 = vmatmul.msk.f32.vlgmr.msrb.gmra.mxu2 %vm243_vm2, %v674_v31  ;;  %1045 = vmatmul.msk.f32.vlgmr.msrb.gmra.mxu3 %vm243_vm2, %v674_v31 }
 0x6c4   :  { %1046 = vmatmul.msk.f32.vlgmr.msra.gmra.mxu0 %vm243_vm2, %v674_v31  ;;  %1047 = vmatmul.msk.f32.vlgmr.msra.gmra.mxu1 %vm243_vm2, %v674_v31 }
 0x741   :  { %v773_v54 = vpop.f32.mrf.mxu0  ;;  %v793_v55 = vpop.f32.mrf.mxu1 }
 0x742   :  { %v774_v56 = vadd.f32 %v773_v54, %v752_v51  ;;  %v794_v57 = vadd.f32 %v793_v55, %v753_v52 }
 0x744   :  { %v796_v60 = vmax.f32 %v774_v56, 0.0  ;;  %v797_v61 = vmax.f32 %v794_v57, 0.0 }
 0x746   :  { %v714_v62 = vpop.f32.mrf.mxu2  ;;  %v734_v63 = vpop.f32.mrf.mxu3  ;;  %982 = vmatmul.f32.vlgmr.msrb.gmra.mxu0 %v796_v60  ;;  %1002 = vmatmul.f32.vlgmr.msrb.gmra.mxu1 %v797_v61 }
 0x747   :  { %v715_v0 = vadd.f32 %v714_v62, %v690_v58  ;;  %v735_v1 = vadd.f32 %v734_v63, %v691_v59 }
 0x749   :  { %v737_v2 = vmax.f32 %v715_v0, 0.0  ;;  %v738_v3 = vmax.f32 %v735_v1, 0.0 }
 0x74b   :  { %942 = vmatmul.f32.vlgmr.msra.gmra.mxu2 %v737_v2  ;;  %962 = vmatmul.f32.vlgmr.msra.gmra.mxu3 %v738_v3 }
 0x7c3   :  { %v983_v9 = vpop.f32.mrf.mxu0  ;;  %v1003_v11 = vpop.f32.mrf.mxu1 }
 0x7ce   :  { %v943_v5 = vpop.f32.mrf.mxu2  ;;  %v963_v7 = vpop.f32.mrf.mxu3 }
 0x7cf   :  { %v944_v6 = vadd.f32 %v943_v5, %v33_v4 }
 0x7d1   :  { %v964_v8 = vadd.f32 %v963_v7, %v944_v6 }
 0x7d3   :  { %v984_v10 = vadd.f32 %v983_v9, %v964_v8 }
 0x7d5   :  { %v1004_v12 = vadd.f32 %v1003_v11, %v984_v10 }
 0x7d7   :  { %1007 = vst.msk [vmem:[%s1751_s6] sm:$0x3] %vm1006_vm0, %v1004_v12 }

</bundles_post_ra>
